<compile_context>
chip_gen: v5e
topology: v5e:2x2
jax: 0.10.0
libtpu: 0.0.40
codegen_flags: <defaults>
</compile_context>

<pallas_src>
import jax
import jax.numpy as jnp
from jax.experimental import pallas as pl
from jax.experimental.pallas import tpu as pltpu

SPATIAL_LAMBDA = 0.1
_OUT_LANES = 128  # lane-dense packed scalar output


def _make_kernel(n_total, spatial_lambda):
    """Build the kernel; n_total = B * N of the *full* problem (for the means)."""
    inv_n = 1.0 / float(n_total)
    spatial_lambda = float(spatial_lambda)

    def kernel(dist_ref, valid_ref, uncert_ref, tdist_ref, tmask_ref, out_ref,
               sq_acc, bce_acc, unc_acc, inv_acc, num_acc, den_acc):
        pid = pl.program_id(0)
        last = pl.num_programs(0) - 1

        @pl.when(pid == 0)
        def _init():
            for acc in (sq_acc, bce_acc, unc_acc, inv_acc, num_acc, den_acc):
                acc[...] = jnp.zeros_like(acc)

        # Upcast on-chip (inputs may be bf16; compute in f32).
        dist = dist_ref[...].astype(jnp.float32)
        valid = valid_ref[...].astype(jnp.float32)
        uncert = uncert_ref[...].astype(jnp.float32)
        tdist = tdist_ref[...].astype(jnp.float32)
        tmask = tmask_ref[...].astype(jnp.float32)

        tb, n = dist.shape  # static tile shape

        valid_mask = (tmask > 0).astype(jnp.float32)  # exactly {0, 1}

        # distance / uncertainty terms: multiply by the {0,1} mask (no select)
        err = dist - tdist
        sq = err * err
        sq_m = sq * valid_mask
        unc_m = (jnp.exp(-uncert) * sq + uncert) * valid_mask

        # BCE with logs clamped at -100 (matches F.binary_cross_entropy)
        log_v = jnp.maximum(jnp.log(valid), -100.0)
        log_1mv = jnp.maximum(jnp.log(1.0 - valid), -100.0)
        bce = -(valid_mask * log_v + (1.0 - valid_mask) * log_1mv)

        # invalid penalty
        inv_m = jnp.abs(dist) * (1.0 - valid_mask)

        # Spatial consistency: neighbour along the measurement (lane) axis,
        # computed in-kernel on the XLU via roll (no extra HBM streams).
        # Rolling the lane iota as well lets us detect the wrap-around column
        # independently of the roll direction convention: a position is a real
        # adjacent pair iff |rolled_index - index| == 1.  (For n == 2 the single
        # pair is counted twice in both num and den, leaving the ratio intact.)
        lane = jax.lax.broadcasted_iota(jnp.int32, (tb, n), 1)
        lane_s = pltpu.roll(lane, shift=n - 1, axis=1)
        adjacent = (jnp.abs(lane_s - lane) == 1).astype(jnp.float32)

        dist_s = pltpu.roll(dist, shift=n - 1, axis=1)
        mask_s = pltpu.roll(valid_mask, shift=n - 1, axis=1)
        pair_valid = valid_mask * mask_s * adjacent
        pair_diff = jnp.abs(dist_s - dist) * pair_valid

        # Per-tile partial sums: collapse only the sublane (batch) axis here;
        # the lane reduction is done once, in the finalize step.
        sq_acc[...] += jnp.sum(sq_m, axis=0, keepdims=True)
        bce_acc[...] += jnp.sum(bce, axis=0, keepdims=True)
        unc_acc[...] += jnp.sum(unc_m, axis=0, keepdims=True)
        inv_acc[...] += jnp.sum(inv_m, axis=0, keepdims=True)
        num_acc[...] += jnp.sum(pair_diff, axis=0, keepdims=True)
        den_acc[...] += jnp.sum(pair_valid, axis=0, keepdims=True)

        @pl.when(pid == last)
        def _finalize():
            dist_loss = jnp.sum(sq_acc[...], keepdims=True) * inv_n
            valid_loss = jnp.sum(bce_acc[...], keepdims=True) * inv_n
            uncert_loss = jnp.sum(unc_acc[...], keepdims=True) * inv_n
            invalid_loss = jnp.sum(inv_acc[...], keepdims=True) * inv_n
            num = jnp.sum(num_acc[...], keepdims=True)
            den = jnp.sum(den_acc[...], keepdims=True)
            spatial = jnp.where(den > 0.0, num / jnp.maximum(den, 1.0),
                                jnp.zeros_like(num))

            total = (dist_loss + valid_loss + 0.1 * uncert_loss
                     + 0.1 * invalid_loss + spatial_lambda * spatial)

            # Pack the six scalars into a single lane-dense (1, 128) output.
            out_lane = jax.lax.broadcasted_iota(jnp.int32, (1, _OUT_LANES), 1)
            packed = jnp.where(out_lane == 0, total, 0.0)
            packed = jnp.where(out_lane == 1, dist_loss, packed)
            packed = jnp.where(out_lane == 2, valid_loss, packed)
            packed = jnp.where(out_lane == 3, uncert_loss, packed)
            packed = jnp.where(out_lane == 4, invalid_loss, packed)
            packed = jnp.where(out_lane == 5, spatial, packed)
            out_ref[...] = packed

    return kernel


def _as_float_input(x):
    """Pass floating inputs through unchanged (bf16 stays bf16); cast ints/bools."""
    x = jnp.asarray(x)
    if jnp.issubdtype(x.dtype, jnp.floating):
        return x
    return x.astype(jnp.float32)


def _choose_block_rows(batch, n_meas, bytes_per_elem=4):
    """Batch-tile (sublane) size.

    Keeps the double-buffered VMEM footprint of the 5 input streams under
    ~16 MiB so the same tiling is safe on v7x (64 MiB VMEM, 32 MiB scoped
    default) as well as v5e/v6e (128 MiB).
    """
    budget = 16 * 1024 * 1024
    rows = budget // (5 * 2 * n_meas * bytes_per_elem)
    rows = max(8, (rows // 8) * 8)
    if batch <= rows:
        return batch                     # whole array fits comfortably
    tb = rows
    while tb >= 8:
        if batch % tb == 0:              # multiple-of-8 divisor of B
            return tb
        tb -= 8
    return batch                         # fallback: single full-array tile


def mapping_loss(pred, target_dist, target_mask, *, block_rows=None,
                 spatial_lambda=SPATIAL_LAMBDA):
    """pred: dict with 'raw_distances', 'validity', 'uncertainty', each (B, N)."""
    dist = _as_float_input(pred['raw_distances'])
    valid = _as_float_input(pred['validity'])
    uncert = _as_float_input(pred['uncertainty'])
    tdist = _as_float_input(target_dist)
    tmask = _as_float_input(target_mask)

    B, N = dist.shape

    tb = block_rows if block_rows is not None else _choose_block_rows(B, N)
    if tb != B and (tb % 8 != 0 or B % tb != 0 or tb > B):
        raise ValueError(f"block_rows={tb} must equal B={B} or be a "
                         f"multiple-of-8 divisor of B")
    grid = (B // tb,)

    in_spec = pl.BlockSpec((tb, N), lambda i: (i, 0))
    out_spec = pl.BlockSpec((1, _OUT_LANES), lambda i: (0, 0))

    kernel = _make_kernel(B * N, spatial_lambda)

    packed = pl.pallas_call(
        kernel,
        grid=grid,
        in_specs=[in_spec] * 5,
        out_specs=out_spec,
        out_shape=jax.ShapeDtypeStruct((1, _OUT_LANES), jnp.float32),
        scratch_shapes=[pltpu.VMEM((1, N), jnp.float32)] * 6,
        compiler_params=pltpu.CompilerParams(
            dimension_semantics=("arbitrary",)),  # reduction axis
    )(dist, valid, uncert, tdist, tmask)

    total = packed[0, 0]
    loss_components = {
        'distance': packed[0, 1],
        'validity': packed[0, 2],
        'uncertainty': packed[0, 3],
        'invalid': packed[0, 4],
        'spatial': packed[0, 5],
    }
    return total, loss_components


def _reference_loss(pred, target_dist, target_mask, spatial_lambda=SPATIAL_LAMBDA):
    """Pure-JAX reference mirroring the PyTorch forward, for verification."""
    dist = pred['raw_distances'].astype(jnp.float32)
    valid = pred['validity'].astype(jnp.float32)
    uncert = pred['uncertainty'].astype(jnp.float32)
    tdist = target_dist.astype(jnp.float32)
    valid_mask = (target_mask > 0).astype(jnp.float32)

    sq = (dist - tdist) ** 2
    dist_loss = jnp.where(valid_mask == 1, sq, 0.0).mean()
    bce = -(valid_mask * jnp.maximum(jnp.log(valid), -100.0)
            + (1 - valid_mask) * jnp.maximum(jnp.log(1 - valid), -100.0))
    valid_loss = bce.mean()
    uncert_loss = jnp.where(valid_mask == 1,
                            jnp.exp(-uncert) * sq + uncert, 0.0).mean()
    invalid_loss = jnp.where(valid_mask == 0, jnp.abs(dist), 0.0).mean()
    diffs = jnp.abs(dist[:, 1:] - dist[:, :-1])
    vp = valid_mask[:, 1:] * valid_mask[:, :-1]
    spatial = jnp.where(vp.sum() > 0,
                        (diffs * vp).sum() / jnp.maximum(vp.sum(), 1.0), 0.0)
    total = (dist_loss + valid_loss + 0.1 * uncert_loss
             + 0.1 * invalid_loss + spatial_lambda * spatial)
    comps = {'distance': dist_loss, 'validity': valid_loss,
             'uncertainty': uncert_loss, 'invalid': invalid_loss,
             'spatial': spatial}
    return total, comps


if __name__ == "__main__":
    key = jax.random.PRNGKey(0)
    k1, k2, k3, k4, k5 = jax.random.split(key, 5)
    B, N = 16, 128   # (batch, num LiDAR-style range measurements)

    pred = {
        'raw_distances': jax.random.uniform(k1, (B, N), jnp.float32) * 10.0,
        'validity': jax.nn.sigmoid(jax.random.normal(k2, (B, N), jnp.float32)),
        'uncertainty': jax.random.normal(k3, (B, N), jnp.float32) * 0.5,
    }
    target_dist = jax.random.uniform(k4, (B, N), jnp.float32) * 10.0
    target_mask = (jax.random.uniform(k5, (B, N), jnp.float32) > 0.3).astype(jnp.float32)

    ref_total, ref_comps = _reference_loss(pred, target_dist, target_mask)
    ref_total = jax.block_until_ready(ref_total)

    # Run once with the auto-chosen tile (single grid step) and once with a
    # forced 8-row tile (grid=(2,)) to exercise the multi-tile accumulation path.
    for block_rows in (None, 8):
        total, comps = mapping_loss(pred, target_dist, target_mask,
                                    block_rows=block_rows)
        total = jax.block_until_ready(total)
        comps = jax.tree_util.tree_map(jax.block_until_ready, comps)
        assert jnp.allclose(total, ref_total, rtol=1e-4, atol=1e-5), (
            block_rows, total, ref_total)
        for name, ref_val in ref_comps.items():
            assert jnp.allclose(comps[name], ref_val, rtol=1e-4, atol=1e-5), (
                block_rows, name, comps[name], ref_val)

    print("KERNEL_OK")
</pallas_src>

<mosaic_0001>
module attributes {stable_mosaic.version = 11 : i64} {
  func.func @kernel(%arg0: i32, %arg1: memref<16x128xf32, #tpu.memory_space<vmem>>, %arg2: memref<16x128xf32, #tpu.memory_space<vmem>>, %arg3: memref<16x128xf32, #tpu.memory_space<vmem>>, %arg4: memref<16x128xf32, #tpu.memory_space<vmem>>, %arg5: memref<16x128xf32, #tpu.memory_space<vmem>>, %arg6: memref<1x128xf32, #tpu.memory_space<vmem>>, %arg7: memref<1x128xf32, #tpu.memory_space<vmem>>, %arg8: memref<1x128xf32, #tpu.memory_space<vmem>>, %arg9: memref<1x128xf32, #tpu.memory_space<vmem>>, %arg10: memref<1x128xf32, #tpu.memory_space<vmem>>, %arg11: memref<1x128xf32, #tpu.memory_space<vmem>>, %arg12: memref<1x128xf32, #tpu.memory_space<vmem>>) attributes {dimension_semantics = [#tpu.dimension_semantics<arbitrary>], iteration_bounds = array<i64: 1>, scalar_prefetch = 0 : i64, scratch_operands = 6 : i64, tpu.core_type = #tpu.core_type<tc>, window_params = [{transform_indices = @transform_0, window_bounds = array<i64: 16, 128>}, {transform_indices = @transform_1, window_bounds = array<i64: 16, 128>}, {transform_indices = @transform_2, window_bounds = array<i64: 16, 128>}, {transform_indices = @transform_3, window_bounds = array<i64: 16, 128>}, {transform_indices = @transform_4, window_bounds = array<i64: 16, 128>}, {pipeline_mode = #tpu.pipeline_mode<synchronous>, transform_indices = @transform_5, window_bounds = array<i64: 1, 128>}]} {
    %c0_i32 = arith.constant 0 : i32
    %0 = arith.cmpi eq, %arg0, %c0_i32 : i32
    %1 = arith.extui %0 : i1 to i32
    %c0_i32_0 = arith.constant 0 : i32
    %2 = arith.cmpi ne, %1, %c0_i32_0 : i32
    scf.if %2 {
      %cst_51 = arith.constant 0.000000e+00 : f32
      %88 = vector.broadcast %cst_51 : f32 to vector<1x128xf32>
      %c0_52 = arith.constant 0 : index
      %c0_53 = arith.constant 0 : index
      %89 = vector.load %arg7[%c0_52, %c0_53] : memref<1x128xf32, #tpu.memory_space<vmem>>, vector<1x128xf32>
      tpu.vector_store %arg7[%c0_52, %c0_53], %88 {strides = array<i32>} : memref<1x128xf32, #tpu.memory_space<vmem>>, vector<1x128xf32>,
      %cst_54 = arith.constant 0.000000e+00 : f32
      %90 = vector.broadcast %cst_54 : f32 to vector<1x128xf32>
      %c0_55 = arith.constant 0 : index
      %c0_56 = arith.constant 0 : index
      %91 = vector.load %arg8[%c0_55, %c0_56] : memref<1x128xf32, #tpu.memory_space<vmem>>, vector<1x128xf32>
      tpu.vector_store %arg8[%c0_55, %c0_56], %90 {strides = array<i32>} : memref<1x128xf32, #tpu.memory_space<vmem>>, vector<1x128xf32>,
      %cst_57 = arith.constant 0.000000e+00 : f32
      %92 = vector.broadcast %cst_57 : f32 to vector<1x128xf32>
      %c0_58 = arith.constant 0 : index
      %c0_59 = arith.constant 0 : index
      %93 = vector.load %arg9[%c0_58, %c0_59] : memref<1x128xf32, #tpu.memory_space<vmem>>, vector<1x128xf32>
      tpu.vector_store %arg9[%c0_58, %c0_59], %92 {strides = array<i32>} : memref<1x128xf32, #tpu.memory_space<vmem>>, vector<1x128xf32>,
      %cst_60 = arith.constant 0.000000e+00 : f32
      %94 = vector.broadcast %cst_60 : f32 to vector<1x128xf32>
      %c0_61 = arith.constant 0 : index
      %c0_62 = arith.constant 0 : index
      %95 = vector.load %arg10[%c0_61, %c0_62] : memref<1x128xf32, #tpu.memory_space<vmem>>, vector<1x128xf32>
      tpu.vector_store %arg10[%c0_61, %c0_62], %94 {strides = array<i32>} : memref<1x128xf32, #tpu.memory_space<vmem>>, vector<1x128xf32>,
      %cst_63 = arith.constant 0.000000e+00 : f32
      %96 = vector.broadcast %cst_63 : f32 to vector<1x128xf32>
      %c0_64 = arith.constant 0 : index
      %c0_65 = arith.constant 0 : index
      %97 = vector.load %arg11[%c0_64, %c0_65] : memref<1x128xf32, #tpu.memory_space<vmem>>, vector<1x128xf32>
      tpu.vector_store %arg11[%c0_64, %c0_65], %96 {strides = array<i32>} : memref<1x128xf32, #tpu.memory_space<vmem>>, vector<1x128xf32>,
      %cst_66 = arith.constant 0.000000e+00 : f32
      %98 = vector.broadcast %cst_66 : f32 to vector<1x128xf32>
      %c0_67 = arith.constant 0 : index
      %c0_68 = arith.constant 0 : index
      %99 = vector.load %arg12[%c0_67, %c0_68] : memref<1x128xf32, #tpu.memory_space<vmem>>, vector<1x128xf32>
      tpu.vector_store %arg12[%c0_67, %c0_68], %98 {strides = array<i32>} : memref<1x128xf32, #tpu.memory_space<vmem>>, vector<1x128xf32>,
    } else {
    }
    %c0 = arith.constant 0 : index
    %c0_1 = arith.constant 0 : index
    %3 = vector.load %arg1[%c0, %c0_1] : memref<16x128xf32, #tpu.memory_space<vmem>>, vector<16x128xf32>
    %c0_2 = arith.constant 0 : index
    %c0_3 = arith.constant 0 : index
    %4 = vector.load %arg2[%c0_2, %c0_3] : memref<16x128xf32, #tpu.memory_space<vmem>>, vector<16x128xf32>
    %c0_4 = arith.constant 0 : index
    %c0_5 = arith.constant 0 : index
    %5 = vector.load %arg3[%c0_4, %c0_5] : memref<16x128xf32, #tpu.memory_space<vmem>>, vector<16x128xf32>
    %c0_6 = arith.constant 0 : index
    %c0_7 = arith.constant 0 : index
    %6 = vector.load %arg4[%c0_6, %c0_7] : memref<16x128xf32, #tpu.memory_space<vmem>>, vector<16x128xf32>
    %c0_8 = arith.constant 0 : index
    %c0_9 = arith.constant 0 : index
    %7 = vector.load %arg5[%c0_8, %c0_9] : memref<16x128xf32, #tpu.memory_space<vmem>>, vector<16x128xf32>
    %cst = arith.constant 0.000000e+00 : f32
    %8 = vector.broadcast %cst : f32 to vector<16x128xf32>
    %9 = arith.cmpf ogt, %7, %8 : vector<16x128xf32>
    %10 = arith.extui %9 : vector<16x128xi1> to vector<16x128xi32>
    %11 = arith.sitofp %10 : vector<16x128xi32> to vector<16x128xf32>
    %12 = arith.subf %3, %6 : vector<16x128xf32>
    %13 = arith.mulf %12, %12 : vector<16x128xf32>
    %14 = arith.mulf %13, %11 : vector<16x128xf32>
    %cst_10 = arith.constant 0.000000e+00 : f32
    %15 = vector.broadcast %cst_10 : f32 to vector<16x128xf32>
    %16 = arith.subf %15, %5 : vector<16x128xf32>
    %17 = math.exp %16 : vector<16x128xf32>
    %18 = arith.mulf %17, %13 : vector<16x128xf32>
    %19 = arith.addf %18, %5 : vector<16x128xf32>
    %20 = arith.mulf %19, %11 : vector<16x128xf32>
    %21 = math.log %4 : vector<16x128xf32>
    %cst_11 = arith.constant -1.000000e+02 : f32
    %22 = vector.broadcast %cst_11 : f32 to vector<16x128xf32>
    %23 = arith.maximumf %21, %22 : vector<16x128xf32>
    %cst_12 = arith.constant 1.000000e+00 : f32
    %24 = vector.broadcast %cst_12 : f32 to vector<16x128xf32>
    %25 = arith.subf %24, %4 : vector<16x128xf32>
    %26 = math.log %25 : vector<16x128xf32>
    %cst_13 = arith.constant -1.000000e+02 : f32
    %27 = vector.broadcast %cst_13 : f32 to vector<16x128xf32>
    %28 = arith.maximumf %26, %27 : vector<16x128xf32>
    %29 = arith.mulf %11, %23 : vector<16x128xf32>
    %cst_14 = arith.constant 1.000000e+00 : f32
    %30 = vector.broadcast %cst_14 : f32 to vector<16x128xf32>
    %31 = arith.subf %30, %11 : vector<16x128xf32>
    %32 = arith.mulf %31, %28 : vector<16x128xf32>
    %33 = arith.addf %29, %32 : vector<16x128xf32>
    %cst_15 = arith.constant 0.000000e+00 : f32
    %34 = vector.broadcast %cst_15 : f32 to vector<16x128xf32>
    %35 = arith.subf %34, %33 : vector<16x128xf32>
    %36 = math.absf %3 : vector<16x128xf32>
    %cst_16 = arith.constant 1.000000e+00 : f32
    %37 = vector.broadcast %cst_16 : f32 to vector<16x128xf32>
    %38 = arith.subf %37, %11 : vector<16x128xf32>
    %39 = arith.mulf %36, %38 : vector<16x128xf32>
    %40 = tpu.iota {dimensions = array<i32: 1>} : vector<16x128xi32>
    %c127_i32 = arith.constant 127 : i32
    %41 = tpu.dynamic_rotate %40 by %c127_i32 dim 1 : vector<16x128xi32>, i32 -> vector<16x128xi32>
    %42 = arith.subi %41, %40 : vector<16x128xi32>
    %43 = math.absi %42 : vector<16x128xi32>
    %c1_i32 = arith.constant 1 : i32
    %44 = vector.broadcast %c1_i32 : i32 to vector<16x128xi32>
    %45 = arith.cmpi eq, %43, %44 : vector<16x128xi32>
    %46 = arith.extui %45 : vector<16x128xi1> to vector<16x128xi32>
    %47 = arith.sitofp %46 : vector<16x128xi32> to vector<16x128xf32>
    %c127_i32_17 = arith.constant 127 : i32
    %48 = tpu.dynamic_rotate %3 by %c127_i32_17 dim 1 : vector<16x128xf32>, i32 -> vector<16x128xf32>
    %c127_i32_18 = arith.constant 127 : i32
    %49 = tpu.dynamic_rotate %11 by %c127_i32_18 dim 1 : vector<16x128xf32>, i32 -> vector<16x128xf32>
    %50 = arith.mulf %11, %49 : vector<16x128xf32>
    %51 = arith.mulf %50, %47 : vector<16x128xf32>
    %52 = arith.subf %48, %3 : vector<16x128xf32>
    %53 = math.absf %52 : vector<16x128xf32>
    %54 = arith.mulf %53, %51 : vector<16x128xf32>
    %c0_19 = arith.constant 0 : index
    %c0_20 = arith.constant 0 : index
    %55 = vector.load %arg7[%c0_19, %c0_20] : memref<1x128xf32, #tpu.memory_space<vmem>>, vector<1x128xf32>
    %cst_21 = arith.constant dense<0.000000e+00> : vector<128xf32>
    %56 = vector.multi_reduction <add>, %14, %cst_21 [0] : vector<16x128xf32> to vector<128xf32>
    %57 = vector.shape_cast %56 : vector<128xf32> to vector<1x128xf32>
    %58 = arith.addf %55, %57 : vector<1x128xf32>
    %c0_22 = arith.constant 0 : index
    %c0_23 = arith.constant 0 : index
    %59 = vector.load %arg7[%c0_22, %c0_23] : memref<1x128xf32, #tpu.memory_space<vmem>>, vector<1x128xf32>
    tpu.vector_store %arg7[%c0_22, %c0_23], %58 {strides = array<i32>} : memref<1x128xf32, #tpu.memory_space<vmem>>, vector<1x128xf32>,
    %c0_24 = arith.constant 0 : index
    %c0_25 = arith.constant 0 : index
    %60 = vector.load %arg8[%c0_24, %c0_25] : memref<1x128xf32, #tpu.memory_space<vmem>>, vector<1x128xf32>
    %cst_26 = arith.constant dense<0.000000e+00> : vector<128xf32>
    %61 = vector.multi_reduction <add>, %35, %cst_26 [0] : vector<16x128xf32> to vector<128xf32>
    %62 = vector.shape_cast %61 : vector<128xf32> to vector<1x128xf32>
    %63 = arith.addf %60, %62 : vector<1x128xf32>
    %c0_27 = arith.constant 0 : index
    %c0_28 = arith.constant 0 : index
    %64 = vector.load %arg8[%c0_27, %c0_28] : memref<1x128xf32, #tpu.memory_space<vmem>>, vector<1x128xf32>
    tpu.vector_store %arg8[%c0_27, %c0_28], %63 {strides = array<i32>} : memref<1x128xf32, #tpu.memory_space<vmem>>, vector<1x128xf32>,
    %c0_29 = arith.constant 0 : index
    %c0_30 = arith.constant 0 : index
    %65 = vector.load %arg9[%c0_29, %c0_30] : memref<1x128xf32, #tpu.memory_space<vmem>>, vector<1x128xf32>
    %cst_31 = arith.constant dense<0.000000e+00> : vector<128xf32>
    %66 = vector.multi_reduction <add>, %20, %cst_31 [0] : vector<16x128xf32> to vector<128xf32>
    %67 = vector.shape_cast %66 : vector<128xf32> to vector<1x128xf32>
    %68 = arith.addf %65, %67 : vector<1x128xf32>
    %c0_32 = arith.constant 0 : index
    %c0_33 = arith.constant 0 : index
    %69 = vector.load %arg9[%c0_32, %c0_33] : memref<1x128xf32, #tpu.memory_space<vmem>>, vector<1x128xf32>
    tpu.vector_store %arg9[%c0_32, %c0_33], %68 {strides = array<i32>} : memref<1x128xf32, #tpu.memory_space<vmem>>, vector<1x128xf32>,
    %c0_34 = arith.constant 0 : index
    %c0_35 = arith.constant 0 : index
    %70 = vector.load %arg10[%c0_34, %c0_35] : memref<1x128xf32, #tpu.memory_space<vmem>>, vector<1x128xf32>
    %cst_36 = arith.constant dense<0.000000e+00> : vector<128xf32>
    %71 = vector.multi_reduction <add>, %39, %cst_36 [0] : vector<16x128xf32> to vector<128xf32>
    %72 = vector.shape_cast %71 : vector<128xf32> to vector<1x128xf32>
    %73 = arith.addf %70, %72 : vector<1x128xf32>
    %c0_37 = arith.constant 0 : index
    %c0_38 = arith.constant 0 : index
    %74 = vector.load %arg10[%c0_37, %c0_38] : memref<1x128xf32, #tpu.memory_space<vmem>>, vector<1x128xf32>
    tpu.vector_store %arg10[%c0_37, %c0_38], %73 {strides = array<i32>} : memref<1x128xf32, #tpu.memory_space<vmem>>, vector<1x128xf32>,
    %c0_39 = arith.constant 0 : index
    %c0_40 = arith.constant 0 : index
    %75 = vector.load %arg11[%c0_39, %c0_40] : memref<1x128xf32, #tpu.memory_space<vmem>>, vector<1x128xf32>
    %cst_41 = arith.constant dense<0.000000e+00> : vector<128xf32>
    %76 = vector.multi_reduction <add>, %54, %cst_41 [0] : vector<16x128xf32> to vector<128xf32>
    %77 = vector.shape_cast %76 : vector<128xf32> to vector<1x128xf32>
    %78 = arith.addf %75, %77 : vector<1x128xf32>
    %c0_42 = arith.constant 0 : index
    %c0_43 = arith.constant 0 : index
    %79 = vector.load %arg11[%c0_42, %c0_43] : memref<1x128xf32, #tpu.memory_space<vmem>>, vector<1x128xf32>
    tpu.vector_store %arg11[%c0_42, %c0_43], %78 {strides = array<i32>} : memref<1x128xf32, #tpu.memory_space<vmem>>, vector<1x128xf32>,
    %c0_44 = arith.constant 0 : index
    %c0_45 = arith.constant 0 : index
    %80 = vector.load %arg12[%c0_44, %c0_45] : memref<1x128xf32, #tpu.memory_space<vmem>>, vector<1x128xf32>
    %cst_46 = arith.constant dense<0.000000e+00> : vector<128xf32>
    %81 = vector.multi_reduction <add>, %51, %cst_46 [0] : vector<16x128xf32> to vector<128xf32>
    %82 = vector.shape_cast %81 : vector<128xf32> to vector<1x128xf32>
    %83 = arith.addf %80, %82 : vector<1x128xf32>
    %c0_47 = arith.constant 0 : index
    %c0_48 = arith.constant 0 : index
    %84 = vector.load %arg12[%c0_47, %c0_48] : memref<1x128xf32, #tpu.memory_space<vmem>>, vector<1x128xf32>
    tpu.vector_store %arg12[%c0_47, %c0_48], %83 {strides = array<i32>} : memref<1x128xf32, #tpu.memory_space<vmem>>, vector<1x128xf32>,
    %c0_i32_49 = arith.constant 0 : i32
    %85 = arith.cmpi eq, %arg0, %c0_i32_49 : i32
    %86 = arith.extui %85 : i1 to i32
    %c0_i32_50 = arith.constant 0 : i32
    %87 = arith.cmpi ne, %86, %c0_i32_50 : i32
    scf.if %87 {
      %c0_51 = arith.constant 0 : index
      %c0_52 = arith.constant 0 : index
      %88 = vector.load %arg7[%c0_51, %c0_52] : memref<1x128xf32, #tpu.memory_space<vmem>>, vector<1x128xf32>
      %89 = vector.shape_cast %88 : vector<1x128xf32> to vector<1x1x128xf32>
      %cst_53 = arith.constant dense<0.000000e+00> : vector<1xf32>
      %90 = vector.multi_reduction <add>, %89, %cst_53 [1, 2] : vector<1x1x128xf32> to vector<1xf32>
      %91 = vector.shape_cast %90 : vector<1xf32> to vector<1x1x1xf32>
      %92 = vector.extract %91[0, 0, 0] : f32 from vector<1x1x1xf32>
      %93 = vector.broadcast %92 : f32 to vector<1x1xf32>
      %cst_54 = arith.constant 4.8828125E-4 : f32
      %94 = vector.broadcast %cst_54 : f32 to vector<1x1xf32>
      %95 = arith.mulf %93, %94 : vector<1x1xf32>
      %c0_55 = arith.constant 0 : index
      %c0_56 = arith.constant 0 : index
      %96 = vector.load %arg8[%c0_55, %c0_56] : memref<1x128xf32, #tpu.memory_space<vmem>>, vector<1x128xf32>
      %97 = vector.shape_cast %96 : vector<1x128xf32> to vector<1x1x128xf32>
      %cst_57 = arith.constant dense<0.000000e+00> : vector<1xf32>
      %98 = vector.multi_reduction <add>, %97, %cst_57 [1, 2] : vector<1x1x128xf32> to vector<1xf32>
      %99 = vector.shape_cast %98 : vector<1xf32> to vector<1x1x1xf32>
      %100 = vector.extract %99[0, 0, 0] : f32 from vector<1x1x1xf32>
      %101 = vector.broadcast %100 : f32 to vector<1x1xf32>
      %cst_58 = arith.constant 4.8828125E-4 : f32
      %102 = vector.broadcast %cst_58 : f32 to vector<1x1xf32>
      %103 = arith.mulf %101, %102 : vector<1x1xf32>
      %c0_59 = arith.constant 0 : index
      %c0_60 = arith.constant 0 : index
      %104 = vector.load %arg9[%c0_59, %c0_60] : memref<1x128xf32, #tpu.memory_space<vmem>>, vector<1x128xf32>
      %105 = vector.shape_cast %104 : vector<1x128xf32> to vector<1x1x128xf32>
      %cst_61 = arith.constant dense<0.000000e+00> : vector<1xf32>
      %106 = vector.multi_reduction <add>, %105, %cst_61 [1, 2] : vector<1x1x128xf32> to vector<1xf32>
      %107 = vector.shape_cast %106 : vector<1xf32> to vector<1x1x1xf32>
      %108 = vector.extract %107[0, 0, 0] : f32 from vector<1x1x1xf32>
      %109 = vector.broadcast %108 : f32 to vector<1x1xf32>
      %cst_62 = arith.constant 4.8828125E-4 : f32
      %110 = vector.broadcast %cst_62 : f32 to vector<1x1xf32>
      %111 = arith.mulf %109, %110 : vector<1x1xf32>
      %c0_63 = arith.constant 0 : index
      %c0_64 = arith.constant 0 : index
      %112 = vector.load %arg10[%c0_63, %c0_64] : memref<1x128xf32, #tpu.memory_space<vmem>>, vector<1x128xf32>
      %113 = vector.shape_cast %112 : vector<1x128xf32> to vector<1x1x128xf32>
      %cst_65 = arith.constant dense<0.000000e+00> : vector<1xf32>
      %114 = vector.multi_reduction <add>, %113, %cst_65 [1, 2] : vector<1x1x128xf32> to vector<1xf32>
      %115 = vector.shape_cast %114 : vector<1xf32> to vector<1x1x1xf32>
      %116 = vector.extract %115[0, 0, 0] : f32 from vector<1x1x1xf32>
      %117 = vector.broadcast %116 : f32 to vector<1x1xf32>
      %cst_66 = arith.constant 4.8828125E-4 : f32
      %118 = vector.broadcast %cst_66 : f32 to vector<1x1xf32>
      %119 = arith.mulf %117, %118 : vector<1x1xf32>
      %c0_67 = arith.constant 0 : index
      %c0_68 = arith.constant 0 : index
      %120 = vector.load %arg11[%c0_67, %c0_68] : memref<1x128xf32, #tpu.memory_space<vmem>>, vector<1x128xf32>
      %121 = vector.shape_cast %120 : vector<1x128xf32> to vector<1x1x128xf32>
      %cst_69 = arith.constant dense<0.000000e+00> : vector<1xf32>
      %122 = vector.multi_reduction <add>, %121, %cst_69 [1, 2] : vector<1x1x128xf32> to vector<1xf32>
      %123 = vector.shape_cast %122 : vector<1xf32> to vector<1x1x1xf32>
      %124 = vector.extract %123[0, 0, 0] : f32 from vector<1x1x1xf32>
      %125 = vector.broadcast %124 : f32 to vector<1x1xf32>
      %c0_70 = arith.constant 0 : index
      %c0_71 = arith.constant 0 : index
      %126 = vector.load %arg12[%c0_70, %c0_71] : memref<1x128xf32, #tpu.memory_space<vmem>>, vector<1x128xf32>
      %127 = vector.shape_cast %126 : vector<1x128xf32> to vector<1x1x128xf32>
      %cst_72 = arith.constant dense<0.000000e+00> : vector<1xf32>
      %128 = vector.multi_reduction <add>, %127, %cst_72 [1, 2] : vector<1x1x128xf32> to vector<1xf32>
      %129 = vector.shape_cast %128 : vector<1xf32> to vector<1x1x1xf32>
      %130 = vector.extract %129[0, 0, 0] : f32 from vector<1x1x1xf32>
      %131 = vector.broadcast %130 : f32 to vector<1x1xf32>
      %cst_73 = arith.constant 0.000000e+00 : f32
      %132 = vector.broadcast %cst_73 : f32 to vector<1x1xf32>
      %133 = arith.cmpf ogt, %131, %132 : vector<1x1xf32>
      %cst_74 = arith.constant 1.000000e+00 : f32
      %134 = vector.broadcast %cst_74 : f32 to vector<1x1xf32>
      %135 = arith.maximumf %131, %134 : vector<1x1xf32>
      %136 = arith.divf %125, %135 : vector<1x1xf32>
      %cst_75 = arith.constant 0.000000e+00 : f32
      %137 = vector.broadcast %cst_75 : f32 to vector<1x1xf32>
      %138 = arith.select %133, %136, %137 : vector<1x1xi1>, vector<1x1xf32>
      %139 = arith.addf %95, %103 : vector<1x1xf32>
      %cst_76 = arith.constant 1.000000e-01 : f32
      %140 = vector.broadcast %cst_76 : f32 to vector<1x1xf32>
      %141 = arith.mulf %140, %111 : vector<1x1xf32>
      %142 = arith.addf %139, %141 : vector<1x1xf32>
      %cst_77 = arith.constant 1.000000e-01 : f32
      %143 = vector.broadcast %cst_77 : f32 to vector<1x1xf32>
      %144 = arith.mulf %143, %119 : vector<1x1xf32>
      %145 = arith.addf %142, %144 : vector<1x1xf32>
      %cst_78 = arith.constant 1.000000e-01 : f32
      %146 = vector.broadcast %cst_78 : f32 to vector<1x1xf32>
      %147 = arith.mulf %146, %138 : vector<1x1xf32>
      %148 = arith.addf %145, %147 : vector<1x1xf32>
      %149 = tpu.iota {dimensions = array<i32: 1>} : vector<1x128xi32>
      %c0_i32_79 = arith.constant 0 : i32
      %150 = vector.broadcast %c0_i32_79 : i32 to vector<1x128xi32>
      %151 = arith.cmpi eq, %149, %150 : vector<1x128xi32>
      %cst_80 = arith.constant 0.000000e+00 : f32
      %152 = vector.shape_cast %148 : vector<1x1xf32> to vector<1x1xf32>
      %153 = vector.broadcast %152 : vector<1x1xf32> to vector<1x128xf32>
      %154 = vector.broadcast %cst_80 : f32 to vector<1x128xf32>
      %155 = arith.select %151, %153, %154 : vector<1x128xi1>, vector<1x128xf32>
      %c1_i32_81 = arith.constant 1 : i32
      %156 = vector.broadcast %c1_i32_81 : i32 to vector<1x128xi32>
      %157 = arith.cmpi eq, %149, %156 : vector<1x128xi32>
      %158 = vector.shape_cast %95 : vector<1x1xf32> to vector<1x1xf32>
      %159 = vector.broadcast %158 : vector<1x1xf32> to vector<1x128xf32>
      %160 = arith.select %157, %159, %155 : vector<1x128xi1>, vector<1x128xf32>
      %c2_i32 = arith.constant 2 : i32
      %161 = vector.broadcast %c2_i32 : i32 to vector<1x128xi32>
      %162 = arith.cmpi eq, %149, %161 : vector<1x128xi32>
      %163 = vector.shape_cast %103 : vector<1x1xf32> to vector<1x1xf32>
      %164 = vector.broadcast %163 : vector<1x1xf32> to vector<1x128xf32>
      %165 = arith.select %162, %164, %160 : vector<1x128xi1>, vector<1x128xf32>
      %c3_i32 = arith.constant 3 : i32
      %166 = vector.broadcast %c3_i32 : i32 to vector<1x128xi32>
      %167 = arith.cmpi eq, %149, %166 : vector<1x128xi32>
      %168 = vector.shape_cast %111 : vector<1x1xf32> to vector<1x1xf32>
      %169 = vector.broadcast %168 : vector<1x1xf32> to vector<1x128xf32>
      %170 = arith.select %167, %169, %165 : vector<1x128xi1>, vector<1x128xf32>
      %c4_i32 = arith.constant 4 : i32
      %171 = vector.broadcast %c4_i32 : i32 to vector<1x128xi32>
      %172 = arith.cmpi eq, %149, %171 : vector<1x128xi32>
      %173 = vector.shape_cast %119 : vector<1x1xf32> to vector<1x1xf32>
      %174 = vector.broadcast %173 : vector<1x1xf32> to vector<1x128xf32>
      %175 = arith.select %172, %174, %170 : vector<1x128xi1>, vector<1x128xf32>
      %c5_i32 = arith.constant 5 : i32
      %176 = vector.broadcast %c5_i32 : i32 to vector<1x128xi32>
      %177 = arith.cmpi eq, %149, %176 : vector<1x128xi32>
      %178 = vector.shape_cast %138 : vector<1x1xf32> to vector<1x1xf32>
      %179 = vector.broadcast %178 : vector<1x1xf32> to vector<1x128xf32>
      %180 = arith.select %177, %179, %175 : vector<1x128xi1>, vector<1x128xf32>
      %c0_82 = arith.constant 0 : index
      %c0_83 = arith.constant 0 : index
      %181 = vector.load %arg6[%c0_82, %c0_83] : memref<1x128xf32, #tpu.memory_space<vmem>>, vector<1x128xf32>
      tpu.vector_store %arg6[%c0_82, %c0_83], %180 {strides = array<i32>} : memref<1x128xf32, #tpu.memory_space<vmem>>, vector<1x128xf32>,
    } else {
    }
    return
  }
  func.func @transform_0(%arg0: i32) -> (i32, i32) {
    %c0_i32 = arith.constant 0 : i32
    %c0_i32_0 = arith.constant 0 : i32
    return %arg0, %c0_i32 : i32, i32
  }
  func.func @transform_1(%arg0: i32) -> (i32, i32) {
    %c0_i32 = arith.constant 0 : i32
    %c0_i32_0 = arith.constant 0 : i32
    return %arg0, %c0_i32 : i32, i32
  }
  func.func @transform_2(%arg0: i32) -> (i32, i32) {
    %c0_i32 = arith.constant 0 : i32
    %c0_i32_0 = arith.constant 0 : i32
    return %arg0, %c0_i32 : i32, i32
  }
  func.func @transform_3(%arg0: i32) -> (i32, i32) {
    %c0_i32 = arith.constant 0 : i32
    %c0_i32_0 = arith.constant 0 : i32
    return %arg0, %c0_i32 : i32, i32
  }
  func.func @transform_4(%arg0: i32) -> (i32, i32) {
    %c0_i32 = arith.constant 0 : i32
    %c0_i32_0 = arith.constant 0 : i32
    return %arg0, %c0_i32 : i32, i32
  }
  func.func @transform_5(%arg0: i32) -> (i32, i32) {
    %c0_i32 = arith.constant 0 : i32
    %c0_i32_0 = arith.constant 0 : i32
    %c0_i32_1 = arith.constant 0 : i32
    return %c0_i32, %c0_i32_0 : i32, i32
  }
}

</mosaic_0001>

<bundles_post_ra>
// kernel: tpu_custom_call.1
= control target key start
LH: loop header
LB: loop body
LE: loop exit
PB: predicated region body
PF: predicated region fallthrough
CT: control target
= control target key end

     0   :  { %10 = vsyncpa [#allocation9], 0  ;;  %s714_s0 = inlined_call_operand.hbm [shape: f32[16,128], index: 0, kind: input, shape index: {}]   ;;  %s715_s1 = inlined_call_operand.hbm [shape: f32[16,128], index: 1, kind: input, shape index: {}]   ;;  %s716_s2 = inlined_call_operand.hbm [shape: f32[16,128], index: 2, kind: input, shape index: {}]   ;;  %s717_s3 = inlined_call_operand.hbm [shape: f32[16,128], index: 3, kind: input, shape index: {}]   ;;  %s718_s4 = inlined_call_operand.hbm [shape: f32[16,128], index: 4, kind: input, shape index: {}]   ;;  %s719_s5 = inlined_call_operand.hbm [shape: f32[1,128], index: 5, kind: output, shape index: {}]  }
   0x1   :  { %11 = vsyncpa [#allocation12], 0 }
   0x2   :  { %12 = vsyncpa [#allocation15], 0 }
   0x3   :  { %13 = vsyncpa [#allocation10], 0  ;;  %s31_s20 = sshll.u32 %s715_s1, 4  ;;  %s593_s21 = smov [#allocation11]   ;;  %s32_s20 = int_to_ptr.hbm [resolvable:$true] %s31_s20 }
   0x4   :  { %s33_s22 = sshll.u32 %s593_s21, 4  ;;  %s57_s25 = sshll.u32 %s717_s3, 4  ;;  %s34_s22 = int_to_ptr.vmem [resolvable:$true] %s33_s22  ;;  %s58_s25 = int_to_ptr.hbm [resolvable:$true] %s57_s25 }
   0x5   :  { %s594_s26 = smov 128   ;;  %s595_s27 = smov 8  }
   0x6   :  { %39 = dma.hbm_to_vmem [thread:$0]  %s32_s20, 256, %s34_s22, [#allocation12], %s594_s26, %s594_s26, %s595_s27  }
   0x7   :  { %s596_s28 = smov [#allocation14]   ;;  %s18_s7 = sshll.u32 %s714_s0, 4  ;;  %s19_s7 = int_to_ptr.hbm [resolvable:$true] %s18_s7 }
   0x8   :  { %s59_s29 = sshll.u32 %s596_s28, 4  ;;  %s44_s9 = sshll.u32 %s716_s2, 4  ;;  %s60_s29 = int_to_ptr.vmem [resolvable:$true] %s59_s29  ;;  %s45_s9 = int_to_ptr.hbm [resolvable:$true] %s44_s9 }
   0x9   :  { %65 = dma.hbm_to_vmem [thread:$0]  %s58_s25, 256, %s60_s29, [#allocation15], %s594_s26, %s594_s26, %s595_s27  }
   0xa   :  { %s597_s10 = smov [#allocation8]   ;;  %s598_s3 = smov [#allocation13]  }
   0xb   :  { %s20_s11 = sshll.u32 %s597_s10, 4  ;;  %s46_s12 = sshll.u32 %s598_s3, 4  ;;  %s21_s11 = int_to_ptr.vmem [resolvable:$true] %s20_s11  ;;  %s47_s12 = int_to_ptr.vmem [resolvable:$true] %s46_s12 }
   0xc   :  { %26 = dma.hbm_to_vmem [thread:$0]  %s19_s7, 256, %s21_s11, [#allocation9], %s594_s26, %s594_s26, %s595_s27  }
   0xd   :  { %s70_s15 = sshll.u32 %s718_s4, 4  ;;  %s599_s0 = smov [#allocation16]   ;;  %s71_s15 = int_to_ptr.hbm [resolvable:$true] %s70_s15 }
   0xe   :  { %52 = dma.hbm_to_vmem [thread:$0]  %s45_s9, 256, %s47_s12, [#allocation12], %s594_s26, %s594_s26, %s595_s27  }
   0xf   :  { %s72_s16 = sshll.u32 %s599_s0, 4  ;;  %s73_s16 = int_to_ptr.vmem [resolvable:$true] %s72_s16 }
  0x10   :  { %78 = dma.hbm_to_vmem [thread:$0]  %s71_s15, 256, %s73_s16, [#allocation15], %s594_s26, %s594_s26, %s595_s27  }
  0x11   :  { %585 = dma.done.wait [#allocation9], 256  }
  0x12   :  { %586 = vsyncadd [#allocation9], 4294967040 }
  0x13   :  { %587 = dma.done.wait [#allocation12], 512  }
  0x14   :  { %588 = vsyncadd [#allocation12], 4294966784 }
  0x15   :  { %589 = dma.done.wait [#allocation15], 512  }
  0x16   :  { %590 = vsyncadd [#allocation15], 4294966784  ;;  %v171_v0 = vlaneseq  ;;  %v600_v1 = vmov 0.0   ;;  %s601_s2 = smov 127   ;;  %v658_v3 = vld [vmem:[#allocation8 + $0x8] sm:$0xff]  ;;  %v112_v4 = vld [vmem:[#allocation11 + $0x8] sm:$0xff] }
  0x17   :  { %103 = vst [vmem:[#allocation2] sm:$0x1] %v600_v1  ;;  %v114_v5 = vld [vmem:[#allocation13 + $0x8] sm:$0xff]  ;;  %v116_v6 = vld [vmem:[#allocation14 + $0x8] sm:$0xff]  ;;  %427 = vlog2.f32 %v112_v4  ;;  %v150_v9 = vsub.f32 1.0, %v112_v4  ;;  %184 = vrot.lane.b32.xlu1 %v658_v3, %s601_s2  ;;  %v117_v12 = vld [vmem:[#allocation16] sm:$0xff] }
  0x18   :  { %v649_v2 = vand.u32 127, %v171_v0  ;;  %104 = vst [vmem:[#allocation3] sm:$0x1] %v600_v1  ;;  %v118_v7 = vld [vmem:[#allocation16 + $0x8] sm:$0xff]  ;;  %v132_v8 = vsub.f32 0.0, %v114_v5  ;;  %v126_v10 = vsub.f32 %v658_v3, %v116_v6  ;;  %v664_v13 = vld [vmem:[#allocation8] sm:$0xff] }
  0x19   :  { %105 = vst [vmem:[#allocation4] sm:$0x1] %v600_v1  ;;  %vm120_vm0 = vcmp.gt.f32.partialorder %v118_v7, 0.0  ;;  %v168_v11 = vand.u32 2147483647, %v658_v3  ;;  %v111_v14 = vld [vmem:[#allocation11] sm:$0xff]  ;;  %429 = vlog2.f32 %v150_v9 }
  0x1a   :  { %173 = vrot.lane.b32.xlu0 %v649_v2, %s601_s2  ;;  %106 = vst [vmem:[#allocation5] sm:$0x1] %v600_v1  ;;  %v667_v15 = vsel %vm120_vm0, 1.0, %v600_v1  ;;  %v135_v16 = vmul.f32 1.442695, %v132_v8  ;;  %vm119_vm1 = vcmp.gt.f32.partialorder %v117_v12, 0.0  ;;  %v128_v22 = vmul.f32 %v126_v10, %v126_v10 }
  0x1b   :  { %107 = vst [vmem:[#allocation6] sm:$0x1] %v600_v1  ;;  %v113_v17 = vld [vmem:[#allocation13] sm:$0xff]  ;;  %v160_v18 = vsub.f32 1.0, %v667_v15  ;;  %v671_v19 = vsel %vm119_vm1, 1.0, %v600_v1  ;;  %v115_v20 = vld [vmem:[#allocation14] sm:$0xff] }
  0x1c   :  { %108 = vst [vmem:[#allocation7] sm:$0x1] %v600_v1  ;;  %v131_v21 = vsub.f32 0.0, %v113_v17  ;;  %431 = vpow2.f32 %v135_v16  ;;  %v422_v23 = vpack.i.bf16 %v667_v15, %v671_v19  ;;  %v149_v24 = vsub.f32 1.0, %v111_v14  ;;  %s602_s22 = smov [#allocation17]   ;;  %s385_s26 = sshll.u32 %s719_s5, 4  ;;  %s386_s26 = int_to_ptr.hbm [resolvable:$true] %s385_s26 }
  0x1d   :  { %433 = vlog2.f32 %v111_v14  ;;  %v159_v26 = vsub.f32 1.0, %v671_v19  ;;  %v428_v27 = vpop.eup %427  ;;  %v170_v28 = vmul.f32 %v168_v11, %v160_v18  ;;  %v125_v29 = vsub.f32 %v664_v13, %v115_v20  ;;  %s383_s23 = sshll.u32 %s602_s22, 4  ;;  %s384_s23 = int_to_ptr.vmem [resolvable:$true] %s383_s23 }
  0x1e   :  { %v133_v25 = vmul.f32 1.442695, %v131_v21  ;;  %435 = vlog2.f32 %v149_v24  ;;  %v167_v30 = vand.u32 2147483647, %v664_v13  ;;  %v146_v31 = vmul.f32 0.6931472, %v428_v27 }
  0x1f   :  { %v430_v32 = vpop.eup %429  ;;  %v130_v33 = vmul.f32 %v667_v15, %v128_v22  ;;  %423 = vrot.lane.b32.xlu1 %v422_v23, %s601_s2  ;;  %v127_v34 = vmul.f32 %v125_v29, %v125_v29  ;;  %vm264_vm2 = vcmask 1040384   ;;  %vm365_vm10 = vcmp.eq.s32.totalorder %v649_v2, 0 }
  0x20   :  { %437 = vpow2.f32 %v133_v25  ;;  %v169_v35 = vmul.f32 %v167_v30, %v159_v26  ;;  %v148_v36 = vmax.f32 %v146_v31, -100.0  ;;  %v154_v37 = vmul.f32 0.6931472, %v430_v32 }
  0x21   :  { %v129_v39 = vmul.f32 %v671_v19, %v127_v34  ;;  %v230_v14 = vld [vmem:[#allocation5] sm:$0x1]  ;;  %vm367_vm11 = vcmp.eq.s32.totalorder %v649_v2, 1  ;;  %vm369_vm12 = vcmp.eq.s32.totalorder %v649_v2, 2  ;;  %vm371_vm13 = vcmp.eq.s32.totalorder %v649_v2, 3 }
  0x22   :  { %182 = vrot.lane.b32.xlu0 %v664_v13, %s601_s2  ;;  %v432_v38 = vpop.eup %431  ;;  %v231_v40 = vadd.f32 %v170_v28, %v169_v35  ;;  %v156_v42 = vmax.f32 %v154_v37, -100.0  ;;  %v158_v43 = vmul.f32 %v667_v15, %v148_v36  ;;  %v210_v36 = vld [vmem:[#allocation3] sm:$0x1]  ;;  %vm373_vm14 = vcmp.eq.s32.totalorder %v649_v2, 4 }
  0x23   :  { %v434_v41 = vpop.eup %433  ;;  %v138_v44 = vmul.f32 %v432_v38, %v128_v22  ;;  %v201_v47 = vadd.f32 %v130_v33, %v129_v39  ;;  %v200_v22 = vld [vmem:[#allocation2] sm:$0x1]  ;;  %v220_v33 = vld [vmem:[#allocation4] sm:$0x1]  ;;  %vm375_vm15 = vcmp.eq.s32.totalorder %v649_v2, 5 }
  0x24   :  { %v436_v45 = vpop.eup %435  ;;  %v144_v46 = vmul.f32 0.6931472, %v434_v41  ;;  %v232_v48 = vrot.slane %v231_v40, 4  ;;  %v162_v50 = vmul.f32 %v160_v18, %v156_v42 }
  0x25   :  { %v140_v51 = vadd.f32 %v138_v44, %v114_v5  ;;  %v152_v52 = vmul.f32 0.6931472, %v436_v45  ;;  %v202_v55 = vrot.slane %v201_v47, 4 }
  0x26   :  { %v438_v49 = vpop.eup %437  ;;  %v147_v53 = vmax.f32 %v144_v46, -100.0  ;;  %v233_v56 = vadd.f32 %v232_v48, %v231_v40  ;;  %v164_v57 = vadd.f32 %v162_v50, %v158_v43 }
  0x27   :  { %v137_v54 = vmul.f32 %v438_v49, %v127_v34  ;;  %v142_v58 = vmul.f32 %v667_v15, %v140_v51  ;;  %v155_v59 = vmax.f32 %v152_v52, -100.0  ;;  %v203_v62 = vadd.f32 %v202_v55, %v201_v47 }
  0x28   :  { %v157_v60 = vmul.f32 %v671_v19, %v147_v53  ;;  %v234_v63 = vrot.slane %v233_v56, 2  ;;  %v166_v5 = vsub.f32 0.0, %v164_v57 }
  0x29   :  { %v139_v61 = vadd.f32 %v137_v54, %v113_v17  ;;  %v161_v0 = vmul.f32 %v159_v26, %v155_v59  ;;  %v204_v6 = vrot.slane %v203_v62, 2 }
  0x2a   :  { %v235_v7 = vadd.f32 %v234_v63, %v233_v56 }
  0x2b   :  { %v141_v4 = vmul.f32 %v671_v19, %v139_v61  ;;  %v163_v8 = vadd.f32 %v161_v0, %v157_v60  ;;  %v205_v9 = vadd.f32 %v204_v6, %v203_v62 }
  0x2c   :  { %v236_v11 = vrot.slane %v235_v7, 1 }
  0x2d   :  { %v221_v10 = vadd.f32 %v142_v58, %v141_v4  ;;  %v165_v12 = vsub.f32 0.0, %v163_v8  ;;  %v206_v16 = vrot.slane %v205_v9, 1 }
  0x2e   :  { %v237_v20 = vadd.f32 %v236_v11, %v235_v7 }
  0x2f   :  { %v222_v18 = vrot.slane %v221_v10, 4  ;;  %v211_v21 = vadd.f32 %v166_v5, %v165_v12  ;;  %v207_v17 = vadd.f32 %v206_v16, %v205_v9 }
  0x30   :  { %v238_v24 = vadd.f32 %v237_v20, %v230_v14 }
  0x31   :  { %v223_v23 = vadd.f32 %v222_v18, %v221_v10  ;;  %v212_v25 = vrot.slane %v211_v21, 4  ;;  %v208_v26 = vadd.f32 %v207_v17, %v200_v22 }
  0x32   :  { %239 = vst [vmem:[#allocation5] sm:$0x1] %v238_v24 }
  0x33   :  { %v224_v27 = vrot.slane %v223_v23, 2  ;;  %v213_v28 = vadd.f32 %v212_v25, %v211_v21  ;;  %209 = vst [vmem:[#allocation2] sm:$0x1] %v208_v26 }
  0x35   :  { %v225_v29 = vadd.f32 %v224_v27, %v223_v23  ;;  %v214_v30 = vrot.slane %v213_v28, 2 }
  0x37   :  { %v226_v31 = vrot.slane %v225_v29, 1  ;;  %v215_v32 = vadd.f32 %v214_v30, %v213_v28 }
  0x39   :  { %v227_v34 = vadd.f32 %v226_v31, %v225_v29  ;;  %v216_v35 = vrot.slane %v215_v32, 1  ;;  %v303_v46 = vld [vmem:[#allocation5] sm:$0x1] }
  0x3a   :  { %v263_v40 = vld [vmem:[#allocation2] sm:$0x1]  ;;  %v304_v47 = vsel %vm264_vm2, %v303_v46, 0.0 }
  0x3b   :  { %v228_v37 = vadd.f32 %v227_v34, %v220_v33  ;;  %v217_v38 = vadd.f32 %v216_v35, %v215_v32  ;;  %v265_v41 = vsel %vm264_vm2, %v263_v40, 0.0 }
  0x3c   :  { %266 = vadd.xlane.f32.xlu2 %v265_v41 }
  0x3d   :  { %229 = vst [vmem:[#allocation4] sm:$0x1] %v228_v37  ;;  %v218_v39 = vadd.f32 %v217_v38, %v210_v36 }
  0x3f   :  { %219 = vst [vmem:[#allocation3] sm:$0x1] %v218_v39 }
  0x44   :  { %v290_v42 = vld [vmem:[#allocation4] sm:$0x1] }
  0x45   :  { %v291_v44 = vsel %vm264_vm2, %v290_v42, 0.0 }
  0x46   :  { %v277_v43 = vld [vmem:[#allocation3] sm:$0x1] }
  0x47   :  { %v278_v45 = vsel %vm264_vm2, %v277_v43, 0.0 }
  0x48   :  { %279 = vadd.xlane.f32.xlu2 %v278_v45 }
  0x49   :  { %305 = vadd.xlane.f32.xlu1 %v304_v47 }
  0x4c   :  { %292 = vadd.xlane.f32.xlu0 %v291_v44 }
  0x89   :  { %v185_v50 = vpop.permute.xlu1 %184 }
  0x8a   :  { %v195_v56 = vsub.f32 %v185_v50, %v658_v3 }
  0x8c   :  { %v174_v48 = vpop.permute.xlu0 %173  ;;  %v197_v63 = vand.u32 2147483647, %v195_v56 }
  0x8d   :  { %v175_v49 = vsub.s32 %v174_v48, %v649_v2 }
  0x8f   :  { %v177_v51 = vsub.s32 0, %v175_v49  ;;  %vm176_vm3 = vcmp.lt.s32.totalorder %v175_v49, 0 }
  0x91   :  { %v178_v53 = vsel %vm176_vm3, %v177_v51, %v175_v49  ;;  %v424_v55 = vpop.permute.xlu1 %423 }
  0x92   :  { %vm179_vm4 = vcmp.eq.s32.totalorder %v178_v53, 1  ;;  %v426_v57 = vunpack.i.h.bf16 %v424_v55  ;;  %v425_v58 = vunpack.i.l.bf16 %v424_v55 }
  0x93   :  { %v399_v62 = vsel %vm179_vm4, 1.0, %v600_v1  ;;  %v240_v1 = vld [vmem:[#allocation6] sm:$0x1] }
  0x94   :  { %v183_v52 = vpop.permute.xlu0 %182  ;;  %v191_v59 = vmul.f32 %v426_v57, %v667_v15  ;;  %v190_v60 = vmul.f32 %v425_v58, %v671_v19  ;;  %v250_v19 = vld [vmem:[#allocation7] sm:$0x1] }
  0x95   :  { %v194_v54 = vsub.f32 %v183_v52, %v664_v13 }
  0x96   :  { %v193_v0 = vmul.f32 %v399_v62, %v191_v59  ;;  %v192_v4 = vmul.f32 %v399_v62, %v190_v60 }
  0x97   :  { %v196_v61 = vand.u32 2147483647, %v194_v54 }
  0x98   :  { %v199_v6 = vmul.f32 %v197_v63, %v193_v0  ;;  %v251_v7 = vadd.f32 %v193_v0, %v192_v4 }
  0x99   :  { %v198_v5 = vmul.f32 %v196_v61, %v192_v4 }
  0x9a   :  { %v252_v13 = vrot.slane %v251_v7, 4 }
  0x9b   :  { %v241_v8 = vadd.f32 %v199_v6, %v198_v5 }
  0x9c   :  { %v253_v9 = vadd.f32 %v252_v13, %v251_v7 }
  0x9d   :  { %v242_v10 = vrot.slane %v241_v8, 4 }
  0x9e   :  { %v254_v3 = vrot.slane %v253_v9, 2 }
  0x9f   :  { %v243_v11 = vadd.f32 %v242_v10, %v241_v8 }
  0xa0   :  { %v255_v12 = vadd.f32 %v254_v3, %v253_v9 }
  0xa1   :  { %v244_v14 = vrot.slane %v243_v11, 2 }
  0xa2   :  { %v256_v15 = vrot.slane %v255_v12, 1 }
  0xa3   :  { %v245_v16 = vadd.f32 %v244_v14, %v243_v11 }
  0xa4   :  { %v257_v18 = vadd.f32 %v256_v15, %v255_v12 }
  0xa5   :  { %v246_v20 = vrot.slane %v245_v16, 1 }
  0xa6   :  { %v258_v22 = vadd.f32 %v257_v18, %v250_v19 }
  0xa7   :  { %v247_v21 = vadd.f32 %v246_v20, %v245_v16 }
  0xa8   :  { %259 = vst [vmem:[#allocation7] sm:$0x1] %v258_v22 }
  0xa9   :  { %v248_v17 = vadd.f32 %v247_v21, %v240_v1 }
  0xab   :  { %249 = vst [vmem:[#allocation6] sm:$0x1] %v248_v17 }
  0xaf   :  { %v328_v25 = vld [vmem:[#allocation7] sm:$0x1]  ;;  %v267_v27 = vpop.xlane.xlu2 %266 }
  0xb0   :  { %v329_v26 = vsel %vm264_vm2, %v328_v25, 0.0  ;;  %v268_v28 = vrot.slane %v267_v27, 4 }
  0xb2   :  { %v316_v23 = vld [vmem:[#allocation6] sm:$0x1]  ;;  %v269_v29 = vadd.f32 %v268_v28, %v267_v27 }
  0xb3   :  { %v317_v24 = vsel %vm264_vm2, %v316_v23, 0.0 }
  0xb4   :  { %318 = vadd.xlane.f32.xlu2 %v317_v24  ;;  %v270_v30 = vrot.slane %v269_v29, 2 }
  0xb6   :  { %v271_v31 = vadd.f32 %v270_v30, %v269_v29 }
  0xb8   :  { %v272_v36 = vrot.slane %v271_v31, 1 }
  0xba   :  { %v273_v41 = vadd.f32 %v272_v36, %v271_v31 }
  0xbb   :  { %v280_v33 = vpop.xlane.xlu2 %279 }
  0xbc   :  { %330 = vadd.xlane.f32.xlu2 %v329_v26  ;;  %v281_v35 = vrot.slane %v280_v33, 4  ;;  %v306_v37 = vpop.xlane.xlu1 %305  ;;  %400 = vpush %v273_v41 }
  0xbd   :  { %v307_v40 = vrot.slane %v306_v37, 4 }
  0xbe   :  { %v282_v39 = vadd.f32 %v281_v35, %v280_v33 }
  0xbf   :  { %v293_v32 = vpop.xlane.xlu0 %292  ;;  %v308_v44 = vadd.f32 %v307_v40, %v306_v37 }
  0xc0   :  { %v294_v34 = vrot.slane %v293_v32, 4  ;;  %v283_v43 = vrot.slane %v282_v39, 2 }
  0xc1   :  { %v309_v46 = vrot.slane %v308_v44, 2 }
  0xc2   :  { %v295_v38 = vadd.f32 %v294_v34, %v293_v32  ;;  %v284_v47 = vadd.f32 %v283_v43, %v282_v39 }
  0xc3   :  { %v310_v48 = vadd.f32 %v309_v46, %v308_v44 }
  0xc4   :  { %v296_v42 = vrot.slane %v295_v38, 2  ;;  %v285_v49 = vrot.slane %v284_v47, 1 }
  0xc5   :  { %v311_v53 = vrot.slane %v310_v48, 1 }
  0xc6   :  { %v297_v45 = vadd.f32 %v296_v42, %v295_v38  ;;  %v286_v51 = vadd.f32 %v285_v49, %v284_v47 }
  0xc7   :  { %v312_v54 = vadd.f32 %v311_v53, %v310_v48 }
  0xc8   :  { %v298_v50 = vrot.slane %v297_v45, 1  ;;  %402 = vpush %v286_v51 }
  0xca   :  { %v299_v52 = vadd.f32 %v298_v50, %v297_v45 }
  0xcc   :  { %404 = vpush %v299_v52 }
  0xcd   :  { %406 = vpush %v312_v54 }
  0xed   :  { %s401_s4 = spop %400 }
  0xee   :  { %v275_v9 = vstv %s401_s4 }
  0xef   :  { %v276_v14 = vmul.f32 0.00048828125, %v275_v9 }
  0xf9   :  { %s403_s17 = spop %402 }
  0xfa   :  { %v288_v10 = vstv %s403_s17 }
  0xfb   :  { %v289_v15 = vmul.f32 0.00048828125, %v288_v10 }
  0xfd   :  { %s405_s18 = spop %404  ;;  %v358_v22 = vadd.f32 %v289_v15, %v276_v14 }
  0xfe   :  { %s407_s19 = spop %406  ;;  %v301_v3 = vstv %s405_s18 }
  0xff   :  { %v302_v16 = vmul.f32 0.00048828125, %v301_v3  ;;  %v314_v19 = vstv %s407_s19 }
 0x100   :  { %v315_v23 = vmul.f32 0.00048828125, %v314_v19 }
 0x101   :  { %v359_v17 = vmul.f32 0.1, %v302_v16 }
 0x102   :  { %v361_v28 = vmul.f32 0.1, %v315_v23 }
 0x103   :  { %v360_v27 = vadd.f32 %v359_v17, %v358_v22 }
 0x105   :  { %v362_v33 = vadd.f32 %v361_v28, %v360_v27 }
 0x127   :  { %v319_v55 = vpop.xlane.xlu2 %318 }
 0x128   :  { %v320_v56 = vrot.slane %v319_v55, 4 }
 0x12a   :  { %v321_v57 = vadd.f32 %v320_v56, %v319_v55 }
 0x12c   :  { %v322_v58 = vrot.slane %v321_v57, 2 }
 0x12e   :  { %v323_v59 = vadd.f32 %v322_v58, %v321_v57 }
 0x12f   :  { %v331_v60 = vpop.xlane.xlu2 %330 }
 0x130   :  { %v332_v61 = vrot.slane %v331_v60, 4  ;;  %v324_v62 = vrot.slane %v323_v59, 1 }
 0x132   :  { %v333_v63 = vadd.f32 %v332_v61, %v331_v60  ;;  %v325_v0 = vadd.f32 %v324_v62, %v323_v59 }
 0x134   :  { %v334_v4 = vrot.slane %v333_v63, 2  ;;  %408 = vpush %v325_v0 }
 0x136   :  { %v335_v6 = vadd.f32 %v334_v4, %v333_v63 }
 0x138   :  { %v336_v7 = vrot.slane %v335_v6, 1 }
 0x13a   :  { %v337_v5 = vadd.f32 %v336_v7, %v335_v6 }
 0x13c   :  { %410 = vpush %v337_v5 }
 0x165   :  { %s699_s20 = spop %408 }
 0x166   :  { %v327_v29 = vstv %s699_s20 }
 0x16d   :  { %s701_s21 = spop %410 }
 0x16e   :  { %v339_v13 = vstv %s701_s21 }
 0x16f   :  { %v341_v8 = vmax.f32 %v339_v13, 1.0  ;;  %vm340_vm9 = vcmp.gt.f32.partialorder %v339_v13, 0.0 }
 0x171   :  { %439 = vrcp.f32 %v341_v8  ;;  %v353_v20 = vand.u32 2147483648, %v341_v8  ;;  %v351_v21 = vand.u32 2147483647, %v341_v8  ;;  %vm347_vm6 = vweird.f32 %v341_v8 }
 0x173   :  { %v354_v25 = vor.u32 1.1754944e-38, %v353_v20  ;;  %vm352_vm8 = vcmp.eq.f32.partialorder %v351_v21, 8.507059e+37 }
 0x177   :  { %v440_v11 = vpop.eup %439 }
 0x178   :  { %v343_v12 = vmul.f32 %v440_v11, %v341_v8  ;;  %vm348_vm5 = vweird.f32 %v440_v11 }
 0x179   :  { %vm349_vm7 = vmor %vm347_vm6, %vm348_vm5 }
 0x17a   :  { %v344_v18 = vsub.f32 1.0, %v343_v12 }
 0x17c   :  { %v345_v1 = vmul.f32 %v440_v11, %v344_v18 }
 0x17e   :  { %v346_v24 = vadd.f32 %v440_v11, %v345_v1 }
 0x180   :  { %v350_v26 = vsel %vm349_vm7, %v440_v11, %v346_v24 }
 0x181   :  { %v355_v30 = vsel %vm352_vm8, %v354_v25, %v350_v26 }
 0x182   :  { %v356_v31 = vmul.f32 %v355_v30, %v327_v29 }
 0x184   :  { %v357_v32 = vsel %vm340_vm9, %v356_v31, 0.0 }
 0x185   :  { %v363_v34 = vmul.f32 0.1, %v357_v32 }
 0x187   :  { %v364_v35 = vadd.f32 %v363_v34, %v362_v33 }
 0x189   :  { %v366_v36 = vsel %vm365_vm10, %v364_v35, 0.0 }
 0x18a   :  { %v368_v37 = vsel %vm367_vm11, %v276_v14, %v366_v36 }
 0x18b   :  { %v370_v38 = vsel %vm369_vm12, %v289_v15, %v368_v37 }
 0x18c   :  { %v372_v39 = vsel %vm371_vm13, %v302_v16, %v370_v38 }
 0x18d   :  { %v374_v40 = vsel %vm373_vm14, %v315_v23, %v372_v39 }
 0x18e   :  { %v376_v41 = vsel %vm375_vm15, %v357_v32, %v374_v40 }
 0x18f   :  { %377 = vst [vmem:[#allocation17] sm:$0x1] %v376_v41 }
 0x190   :  { %388 = dma.vmem_to_hbm [thread:$0]  %s384_s23, 16, %s386_s26, [#allocation10]  }
 0x191   :  { %591 = dma.done.wait [#allocation10], 16  }
 0x192   :  { %592 = vsyncadd [#allocation10], 4294967280 }
 0x193   :  { %393 = vsyncpa [#allocation9], 1 }
 0x194   :  { %394 = vsyncpa [#allocation12], 1 }
 0x195   :  { %395 = vsyncpa [#allocation15], 1 }
 0x196   :  { %396 = vsyncpa [#allocation10], 1 }

</bundles_post_ra>
